<compile_context>
chip_gen: v5e
topology: v5e:2x2
jax: 0.10.0
libtpu: 0.0.40
codegen_flags: <defaults>
</compile_context>

<pallas_src>
import functools

import jax
import jax.numpy as jnp
from jax.experimental import pallas as pl
from jax.experimental.pallas import tpu as pltpu

_LANE = 128


def _round_up(x, m):
    return ((x + m - 1) // m) * m


def _bmc_kernel(tile_n, tiles_per_split,
                n_ref,                              # SMEM [B] int32 (scalar prefetch)
                preds_ref, labels_ref, w_ref, logw_ref,
                out_ref, acc_ref):
    b = pl.program_id(0)
    s = pl.program_id(1)
    t = pl.program_id(2)

    @pl.when(t == 0)
    def _init():
        acc_ref[...] = jnp.zeros_like(acc_ref)

    n_valid = n_ref[b]
    col0 = (s * tiles_per_split + t) * tile_n       # first sample column of this tile

    # Skip all VPU/EUP/XLU work on fully-padded tiles (DMA is already pipelined).
    @pl.when(col0 < n_valid)
    def _compute():
        logits = preds_ref[0]                       # [C, tile_n] f32
        labels = labels_ref[0]                      # [1, tile_n] int32, 0-based
        w = w_ref[0]                                # [C, 1]  class frequencies
        log_w = logw_ref[0]                         # [C, 1]  log(w), 0 where count==0

        # softmax over classes (sublane axis)
        m = jnp.max(logits, axis=0, keepdims=True)                  # [1, tile_n]
        e = jnp.exp(logits - m)
        p = e * (1.0 / jnp.sum(e, axis=0, keepdims=True))           # probs

        # q_ij = exp(p_ij) w_j / denom_i ; only log(denom) and the label entry are needed.
        denom = jnp.sum(jnp.exp(p) * w, axis=0, keepdims=True)      # [1, tile_n]

        crow = jax.lax.broadcasted_iota(jnp.int32, logits.shape, 0)
        onehot = (crow == labels).astype(jnp.float32)               # [C, tile_n]
        # fused gather: p_label + log(w_label) in a single sublane reduce
        gathered = jnp.sum((p + log_w) * onehot, axis=0, keepdims=True)

        nll = jnp.log(denom) - gathered                             # [1, tile_n]

        col = col0 + jax.lax.broadcasted_iota(jnp.int32, nll.shape, 1)
        valid = (col < n_valid).astype(jnp.float32)
        acc_ref[...] += jnp.sum(nll * valid, keepdims=True)

    @pl.when(t == pl.num_programs(2) - 1)
    def _finalize():
        out_ref[...] = acc_ref[...].reshape(out_ref.shape)          # partial sum for (b, s)


def _multi_bmc_loss_batched(preds, targets, *, tile_n=None, target_block_bytes=2 << 20):
    """One fused pallas_call over the whole list. Returns per-item mean losses, shape [B]."""
    B = len(preds)
    C = int(preds[0].shape[1])
    ns = [int(p.shape[0]) for p in preds]
    n_max = max(ns)

    # Tile size: big enough (~2 MiB preds block) to amortize per-grid-step overhead,
    # small enough to stay well under scoped VMEM on every TPU generation.
    if tile_n is None:
        cap = max(_LANE, (target_block_bytes // (4 * C)) // _LANE * _LANE)
        tile_n = min(cap, _round_up(n_max, _LANE))
    tile_n = _round_up(int(tile_n), _LANE)

    n_tiles = -(-n_max // tile_n)
    # Split the tile axis across a second "parallel" grid axis when the batch axis alone
    # cannot feed both v7x TensorCores (single-tensor path with multiple tiles).
    n_split = 2 if (B == 1 and n_tiles >= 2) else 1
    tiles_per_split = -(-n_tiles // n_split)
    n_pad = n_split * tiles_per_split * tile_n

    class_ids = jnp.arange(1, C + 1, dtype=jnp.int32)
    pred_rows, label_rows, w_rows, logw_rows = [], [], [], []
    for p_i, t_i in zip(preds, targets):
        n_i = int(p_i.shape[0])
        t_i = t_i.astype(jnp.int32)

        pt = jnp.transpose(p_i.astype(jnp.float32))                 # [C, n_i] (classes on sublanes)
        pred_rows.append(jnp.pad(pt, ((0, 0), (0, n_pad - n_i))))   # no class padding in HBM

        lab = (t_i - 1).reshape(1, n_i)
        label_rows.append(jnp.pad(lab, ((0, 0), (0, n_pad - n_i))))

        counts = jnp.sum((t_i.reshape(-1, 1) == class_ids.reshape(1, -1)).astype(jnp.int32),
                         axis=0)                                    # [C]
        w = counts.astype(jnp.float32) / counts.sum().astype(jnp.float32)
        log_w = jnp.where(counts > 0, jnp.log(jnp.maximum(w, jnp.float32(1e-30))),
                          jnp.float32(0.0))                         # finite for empty classes
        w_rows.append(w.reshape(C, 1))
        logw_rows.append(log_w.reshape(C, 1))

    preds_p = jnp.stack(pred_rows)                                  # [B, C, n_pad]
    labels_p = jnp.stack(label_rows)                                # [B, 1, n_pad]
    w_p = jnp.stack(w_rows)                                         # [B, C, 1]
    logw_p = jnp.stack(logw_rows)                                   # [B, C, 1]
    n_arr = jnp.asarray(ns, jnp.int32)                              # [B]

    kernel = functools.partial(_bmc_kernel, tile_n, tiles_per_split)
    grid = (B, n_split, tiles_per_split)
    tps = tiles_per_split  # captured by index_maps

    out = pl.pallas_call(
        kernel,
        out_shape=jax.ShapeDtypeStruct((B, n_split, 1, 1), jnp.float32),
        grid_spec=pltpu.PrefetchScalarGridSpec(
            num_scalar_prefetch=1,
            grid=grid,
            in_specs=[
                pl.BlockSpec((1, C, tile_n), lambda b, s, t, n: (b, 0, s * tps + t)),
                pl.BlockSpec((1, 1, tile_n), lambda b, s, t, n: (b, 0, s * tps + t)),
                pl.BlockSpec((1, C, 1), lambda b, s, t, n: (b, 0, 0)),
                pl.BlockSpec((1, C, 1), lambda b, s, t, n: (b, 0, 0)),
            ],
            out_specs=pl.BlockSpec((1, 1, 1, 1), lambda b, s, t, n: (b, s, 0, 0)),
            scratch_shapes=[pltpu.VMEM((1, 1), jnp.float32)],
        ),
        compiler_params=pltpu.CompilerParams(
            dimension_semantics=("parallel", "parallel", "arbitrary")),
    )(n_arr, preds_p, labels_p, w_p, logw_p)

    partial_sums = out[:, :, 0, 0]                                  # [B, n_split]
    return jnp.sum(partial_sums, axis=1) / n_arr.astype(jnp.float32)


def multi_bmc_loss_forward(pred, target):
    """Equivalent of MultiBMCLoss.forward (list or single-tensor input)."""
    if isinstance(pred, (list, tuple)):
        per_item = _multi_bmc_loss_batched(list(pred), list(target))
        return jnp.sum(per_item) / len(pred)
    return _multi_bmc_loss_batched([pred], [target])[0]


def _reference(pred, target):
    """Pure-JAX transcription of MultiBMCLoss.Multi_bmc_loss."""
    pred = pred.astype(jnp.float32)
    C = pred.shape[1]
    p = jax.nn.softmax(pred, axis=1)
    counts = jnp.sum((target.reshape(-1, 1) == jnp.arange(1, C + 1)).astype(jnp.int32), axis=0)
    w = counts.astype(jnp.float32) / counts.sum().astype(jnp.float32)
    num = jnp.exp(p) * w[None, :]
    log_q = jnp.log(num / num.sum(axis=1, keepdims=True))
    labels = (target - 1).astype(jnp.int32)
    nll = -jnp.take_along_axis(log_q, labels[:, None], axis=1)[:, 0]
    return jnp.mean(nll)


if __name__ == "__main__":
    key = jax.random.PRNGKey(0)
    k1, k2, k3, k4, k5, k6, k7, k8 = jax.random.split(key, 8)

    n, c = 8, 5
    preds0 = jax.random.normal(k1, (n, c), jnp.float32)
    target0 = jax.random.randint(k2, (n,), 1, c + 1, dtype=jnp.int32)
    preds1 = jax.random.normal(k3, (n, c), jnp.float32)
    target1 = jax.random.randint(k4, (n,), 1, c + 1, dtype=jnp.int32)

    # 1) list path (the module's main use case)
    loss = jax.block_until_ready(multi_bmc_loss_forward([preds0, preds1], [target0, target1]))
    ref = (_reference(preds0, target0) + _reference(preds1, target1)) / 2.0
    assert jnp.allclose(loss, ref, rtol=1e-4, atol=1e-5), (loss, ref)

    # 2) single-tensor path
    loss_s = jax.block_until_ready(multi_bmc_loss_forward(preds0, target0))
    ref_s = _reference(preds0, target0)
    assert jnp.allclose(loss_s, ref_s, rtol=1e-4, atol=1e-5), (loss_s, ref_s)

    # 3) heterogeneous lengths, forced small tiles -> exercises padded-tile skip path
    preds2 = jax.random.normal(k5, (200, c), jnp.float32)
    target2 = jax.random.randint(k6, (200,), 1, c + 1, dtype=jnp.int32)
    per_item = jax.block_until_ready(
        _multi_bmc_loss_batched([preds0, preds2], [target0, target2], tile_n=128))
    ref_h = jnp.stack([_reference(preds0, target0), _reference(preds2, target2)])
    assert jnp.allclose(per_item, ref_h, rtol=1e-4, atol=1e-5), (per_item, ref_h)

    # 4) single item, multiple tiles -> exercises the 2-way "parallel" tile split (v7x path)
    preds3 = jax.random.normal(k7, (300, c), jnp.float32)
    target3 = jax.random.randint(k8, (300,), 1, c + 1, dtype=jnp.int32)
    loss3 = jax.block_until_ready(
        _multi_bmc_loss_batched([preds3], [target3], tile_n=128)[0])
    ref3 = _reference(preds3, target3)
    assert jnp.allclose(loss3, ref3, rtol=1e-4, atol=1e-5), (loss3, ref3)

    print("KERNEL_OK")
</pallas_src>

<mosaic_0001>
module attributes {stable_mosaic.version = 11 : i64} {
  func.func @_bmc_kernel(%arg0: i32, %arg1: i32, %arg2: i32, %arg3: memref<2xi32, #tpu.memory_space<smem>>, %arg4: memref<1x5x128xf32, #tpu.memory_space<vmem>>, %arg5: memref<1x1x128xi32, #tpu.memory_space<vmem>>, %arg6: memref<1x5x1xf32, #tpu.memory_space<vmem>>, %arg7: memref<1x5x1xf32, #tpu.memory_space<vmem>>, %arg8: memref<1x1x1x1xf32, #tpu.memory_space<vmem>>, %arg9: memref<1x1xf32, #tpu.memory_space<vmem>>) attributes {dimension_semantics = [#tpu.dimension_semantics<parallel>, #tpu.dimension_semantics<parallel>, #tpu.dimension_semantics<arbitrary>], iteration_bounds = array<i64: 2, 1, 1>, scalar_prefetch = 1 : i64, scratch_operands = 1 : i64, tpu.core_type = #tpu.core_type<tc>, window_params = [{transform_indices = @transform_0, window_bounds = array<i64: 1, 5, 128>}, {transform_indices = @transform_1, window_bounds = array<i64: 1, 1, 128>}, {transform_indices = @transform_2, window_bounds = array<i64: 1, 5, 1>}, {transform_indices = @transform_3, window_bounds = array<i64: 1, 5, 1>}, {transform_indices = @transform_4, window_bounds = array<i64: 1, 1, 1, 1>}]} {
    %c0_i32 = arith.constant 0 : i32
    %0 = arith.cmpi eq, %arg2, %c0_i32 : i32
    %1 = arith.extui %0 : i1 to i32
    %c0_i32_0 = arith.constant 0 : i32
    %2 = arith.cmpi ne, %1, %c0_i32_0 : i32
    scf.if %2 {
      %cst = arith.constant 0.000000e+00 : f32
      %14 = vector.broadcast %cst : f32 to vector<1x1xf32>
      %c0 = arith.constant 0 : index
      %c0_4 = arith.constant 0 : index
      %15 = vector.load %arg9[%c0, %c0_4] : memref<1x1xf32, #tpu.memory_space<vmem>>, vector<1x1xf32>
      tpu.vector_store %arg9[%c0, %c0_4], %14 {strides = array<i32>} : memref<1x1xf32, #tpu.memory_space<vmem>>, vector<1x1xf32>,
    } else {
    }
    %3 = arith.index_cast %arg0 : i32 to index
    %4 = memref.load %arg3[%3] : memref<2xi32, #tpu.memory_space<smem>>
    %c1_i32 = arith.constant 1 : i32
    %5 = arith.muli %arg1, %c1_i32 : i32
    %6 = arith.addi %5, %arg2 : i32
    %c128_i32 = arith.constant 128 : i32
    %7 = arith.muli %6, %c128_i32 : i32
    %8 = arith.cmpi slt, %7, %4 : i32
    %9 = arith.extui %8 : i1 to i32
    %c0_i32_1 = arith.constant 0 : i32
    %10 = arith.cmpi ne, %9, %c0_i32_1 : i32
    scf.if %10 {
      %c0 = arith.constant 0 : index
      %c0_4 = arith.constant 0 : index
      %c0_5 = arith.constant 0 : index
      %14 = vector.load %arg4[%c0, %c0_4, %c0_5] : memref<1x5x128xf32, #tpu.memory_space<vmem>>, vector<1x5x128xf32>
      %15 = vector.shape_cast %14 : vector<1x5x128xf32> to vector<5x128xf32>
      %c0_6 = arith.constant 0 : index
      %c0_7 = arith.constant 0 : index
      %c0_8 = arith.constant 0 : index
      %16 = vector.load %arg5[%c0_6, %c0_7, %c0_8] : memref<1x1x128xi32, #tpu.memory_space<vmem>>, vector<1x1x128xi32>
      %17 = vector.shape_cast %16 : vector<1x1x128xi32> to vector<1x128xi32>
      %c0_9 = arith.constant 0 : index
      %c0_10 = arith.constant 0 : index
      %c0_11 = arith.constant 0 : index
      %18 = vector.load %arg6[%c0_9, %c0_10, %c0_11] : memref<1x5x1xf32, #tpu.memory_space<vmem>>, vector<1x5x1xf32>
      %19 = vector.shape_cast %18 : vector<1x5x1xf32> to vector<5x1xf32>
      %c0_12 = arith.constant 0 : index
      %c0_13 = arith.constant 0 : index
      %c0_14 = arith.constant 0 : index
      %20 = vector.load %arg7[%c0_12, %c0_13, %c0_14] : memref<1x5x1xf32, #tpu.memory_space<vmem>>, vector<1x5x1xf32>
      %21 = vector.shape_cast %20 : vector<1x5x1xf32> to vector<5x1xf32>
      %cst = arith.constant dense<0xFF800000> : vector<128xf32>
      %22 = vector.multi_reduction <maximumf>, %15, %cst [0] : vector<5x128xf32> to vector<128xf32>
      %23 = vector.shape_cast %22 : vector<128xf32> to vector<1x128xf32>
      %24 = vector.broadcast %23 : vector<1x128xf32> to vector<5x128xf32>
      %25 = arith.subf %15, %24 : vector<5x128xf32>
      %26 = math.exp %25 : vector<5x128xf32>
      %cst_15 = arith.constant dense<0.000000e+00> : vector<128xf32>
      %27 = vector.multi_reduction <add>, %26, %cst_15 [0] : vector<5x128xf32> to vector<128xf32>
      %28 = vector.shape_cast %27 : vector<128xf32> to vector<1x128xf32>
      %cst_16 = arith.constant 1.000000e+00 : f32
      %29 = vector.broadcast %cst_16 : f32 to vector<1x128xf32>
      %30 = arith.divf %29, %28 : vector<1x128xf32>
      %31 = vector.broadcast %30 : vector<1x128xf32> to vector<5x128xf32>
      %32 = arith.mulf %26, %31 : vector<5x128xf32>
      %33 = math.exp %32 : vector<5x128xf32>
      %34 = vector.broadcast %19 : vector<5x1xf32> to vector<5x128xf32>
      %35 = arith.mulf %33, %34 : vector<5x128xf32>
      %cst_17 = arith.constant dense<0.000000e+00> : vector<128xf32>
      %36 = vector.multi_reduction <add>, %35, %cst_17 [0] : vector<5x128xf32> to vector<128xf32>
      %37 = vector.shape_cast %36 : vector<128xf32> to vector<1x128xf32>
      %38 = tpu.iota {dimensions = array<i32: 0>} : vector<5x128xi32>
      %39 = vector.broadcast %17 : vector<1x128xi32> to vector<5x128xi32>
      %40 = arith.cmpi eq, %38, %39 : vector<5x128xi32>
      %41 = arith.extui %40 : vector<5x128xi1> to vector<5x128xi32>
      %42 = arith.sitofp %41 : vector<5x128xi32> to vector<5x128xf32>
      %43 = vector.broadcast %21 : vector<5x1xf32> to vector<5x128xf32>
      %44 = arith.addf %32, %43 : vector<5x128xf32>
      %45 = arith.mulf %44, %42 : vector<5x128xf32>
      %cst_18 = arith.constant dense<0.000000e+00> : vector<128xf32>
      %46 = vector.multi_reduction <add>, %45, %cst_18 [0] : vector<5x128xf32> to vector<128xf32>
      %47 = vector.shape_cast %46 : vector<128xf32> to vector<1x128xf32>
      %48 = math.log %37 : vector<1x128xf32>
      %49 = arith.subf %48, %47 : vector<1x128xf32>
      %50 = tpu.iota {dimensions = array<i32: 1>} : vector<1x128xi32>
      %51 = vector.broadcast %7 : i32 to vector<1x128xi32>
      %52 = arith.addi %51, %50 : vector<1x128xi32>
      %53 = vector.broadcast %4 : i32 to vector<1x128xi32>
      %54 = arith.cmpi slt, %52, %53 : vector<1x128xi32>
      %55 = arith.extui %54 : vector<1x128xi1> to vector<1x128xi32>
      %56 = arith.sitofp %55 : vector<1x128xi32> to vector<1x128xf32>
      %c0_19 = arith.constant 0 : index
      %c0_20 = arith.constant 0 : index
      %57 = vector.load %arg9[%c0_19, %c0_20] : memref<1x1xf32, #tpu.memory_space<vmem>>, vector<1x1xf32>
      %58 = arith.mulf %49, %56 : vector<1x128xf32>
      %59 = vector.shape_cast %58 : vector<1x128xf32> to vector<1x1x128xf32>
      %cst_21 = arith.constant dense<0.000000e+00> : vector<1xf32>
      %60 = vector.multi_reduction <add>, %59, %cst_21 [1, 2] : vector<1x1x128xf32> to vector<1xf32>
      %61 = vector.shape_cast %60 : vector<1xf32> to vector<1x1x1xf32>
      %62 = vector.extract %61[0, 0, 0] : f32 from vector<1x1x1xf32>
      %63 = vector.broadcast %62 : f32 to vector<1x1xf32>
      %64 = arith.addf %57, %63 : vector<1x1xf32>
      %c0_22 = arith.constant 0 : index
      %c0_23 = arith.constant 0 : index
      %65 = vector.load %arg9[%c0_22, %c0_23] : memref<1x1xf32, #tpu.memory_space<vmem>>, vector<1x1xf32>
      tpu.vector_store %arg9[%c0_22, %c0_23], %64 {strides = array<i32>} : memref<1x1xf32, #tpu.memory_space<vmem>>, vector<1x1xf32>,
    } else {
    }
    %c0_i32_2 = arith.constant 0 : i32
    %11 = arith.cmpi eq, %arg2, %c0_i32_2 : i32
    %12 = arith.extui %11 : i1 to i32
    %c0_i32_3 = arith.constant 0 : i32
    %13 = arith.cmpi ne, %12, %c0_i32_3 : i32
    scf.if %13 {
      %c0 = arith.constant 0 : index
      %c0_4 = arith.constant 0 : index
      %14 = vector.load %arg9[%c0, %c0_4] : memref<1x1xf32, #tpu.memory_space<vmem>>, vector<1x1xf32>
      %15 = vector.shape_cast %14 : vector<1x1xf32> to vector<1x1x1x1xf32>
      %c0_5 = arith.constant 0 : index
      %c0_6 = arith.constant 0 : index
      %c0_7 = arith.constant 0 : index
      %c0_8 = arith.constant 0 : index
      %16 = vector.load %arg8[%c0_5, %c0_6, %c0_7, %c0_8] : memref<1x1x1x1xf32, #tpu.memory_space<vmem>>, vector<1x1x1x1xf32>
      tpu.vector_store %arg8[%c0_5, %c0_6, %c0_7, %c0_8], %15 {strides = array<i32>} : memref<1x1x1x1xf32, #tpu.memory_space<vmem>>, vector<1x1x1x1xf32>,
    } else {
    }
    return
  }
  func.func @transform_0(%arg0: i32, %arg1: i32, %arg2: i32, %arg3: memref<2xi32, #tpu.memory_space<smem>>) -> (i32, i32, i32) {
    %c1_i32 = arith.constant 1 : i32
    %0 = arith.muli %arg1, %c1_i32 : i32
    %1 = arith.addi %0, %arg2 : i32
    %c0_i32 = arith.constant 0 : i32
    %c0_i32_0 = arith.constant 0 : i32
    return %arg0, %c0_i32, %1 : i32, i32, i32
  }
  func.func @transform_1(%arg0: i32, %arg1: i32, %arg2: i32, %arg3: memref<2xi32, #tpu.memory_space<smem>>) -> (i32, i32, i32) {
    %c1_i32 = arith.constant 1 : i32
    %0 = arith.muli %arg1, %c1_i32 : i32
    %1 = arith.addi %0, %arg2 : i32
    %c0_i32 = arith.constant 0 : i32
    %c0_i32_0 = arith.constant 0 : i32
    return %arg0, %c0_i32, %1 : i32, i32, i32
  }
  func.func @transform_2(%arg0: i32, %arg1: i32, %arg2: i32, %arg3: memref<2xi32, #tpu.memory_space<smem>>) -> (i32, i32, i32) {
    %c0_i32 = arith.constant 0 : i32
    %c0_i32_0 = arith.constant 0 : i32
    %c0_i32_1 = arith.constant 0 : i32
    return %arg0, %c0_i32, %c0_i32_0 : i32, i32, i32
  }
  func.func @transform_3(%arg0: i32, %arg1: i32, %arg2: i32, %arg3: memref<2xi32, #tpu.memory_space<smem>>) -> (i32, i32, i32) {
    %c0_i32 = arith.constant 0 : i32
    %c0_i32_0 = arith.constant 0 : i32
    %c0_i32_1 = arith.constant 0 : i32
    return %arg0, %c0_i32, %c0_i32_0 : i32, i32, i32
  }
  func.func @transform_4(%arg0: i32, %arg1: i32, %arg2: i32, %arg3: memref<2xi32, #tpu.memory_space<smem>>) -> (i32, i32, i32, i32) {
    %c0_i32 = arith.constant 0 : i32
    %c0_i32_0 = arith.constant 0 : i32
    %c0_i32_1 = arith.constant 0 : i32
    return %arg0, %arg1, %c0_i32, %c0_i32_0 : i32, i32, i32, i32
  }
}

</mosaic_0001>

<bundles_post_ra>
// kernel: tpu_custom_call.1
= control target key start
LH: loop header
LB: loop body
LE: loop exit
PB: predicated region body
PF: predicated region fallthrough
CT: control target
= control target key end

     0   :  { %s630_s21 = smov [#allocation4]   ;;  %s735_s0 = inlined_call_operand.vmem [shape: s32[2], index: 0, kind: input, shape index: {}]   ;;  %s736_s1 = inlined_call_operand.vmem [shape: f32[2,5,128], index: 1, kind: input, shape index: {}]   ;;  %s737_s2 = inlined_call_operand.vmem [shape: s32[2,1,128], index: 2, kind: input, shape index: {}]   ;;  %s738_s3 = inlined_call_operand.vmem [shape: f32[2,5,1], index: 3, kind: input, shape index: {}]   ;;  %s739_s4 = inlined_call_operand.vmem [shape: f32[2,5,1], index: 4, kind: input, shape index: {}]   ;;  %s740_s5 = inlined_call_operand.vmem [shape: f32[2,1,1,1], index: 5, kind: output, shape index: {}]  }
   0x1   :  { %s11_s20 = sshll.u32 %s735_s0, 4  ;;  %s12_s20 = int_to_ptr.vmem [resolvable:$true] %s11_s20 }
   0x2   :  { %14 = dma.vmem_to_smem %s12_s20, 16, %s630_s21, [#allocation3] }
   0x3   :  { %616 = dma.done.wait [#allocation3], 16 }
   0x4   :  { %617 = vsyncadd [#allocation3], 4294967280 }
   0x5   :  { %17 = sfence }
   0x6   :  { %s667_s22 = smov 0   ;;  %s669_s23 = smov 0  }
   0x7   :  { %s671_s24 = smov 0  }
   0x8 LB: > { %s42_s0 = sadd.s32 1, %s624_s23  ;;  %p542_p0 = scmp.ge.s32.totalorder %s628_s24, 1  ;;  %s628_s24 = sphi %s671_s24, %s23_s24   ;;  %s624_s23 = sphi %s669_s23, %s742_s23   ;;  %s620_s22 = sphi %s667_s22, %s741_s22  }
   0x9   : > { %p44_p1 = scmp.ge.s32.totalorder %s42_s0, 2  ;;  %p235_p2 = scmp.lt.s32.totalorder %s628_s24, 3 }
   0xb   : > { %s744_s0 = smov (%p44_p1, %s42_s0), 0  ;;  %p236_p3 = pnand %p542_p0, %p235_p2 }
   0xc   : > { %p281_p4 = scmp.lt.s32.totalorder (!%p236_p3), %s620_s22, 1  ;;  %s685_s25 = sld [smem:[#allocation4 + %s620_s22]] (!%p236_p3) }
   0xd   : > { %239 = sbr.rel (%p236_p3) target bundleno = 364 (0x16c), region = 36 }
  0x12   : > { %vm315_vm0 = vcmask 0   ;;  %v631_v0 = vmov 0.0   ;;  %s746_s22 = smov (!%p281_p4, %s620_s22), 1  ;;  %p547_p5 = scmp.le.s32.totalorder %s685_s25, 0 }
  0x13   : > { %316 = vst.msk [vmem:[#allocation2] sm:$0x1] %vm315_vm0, %v631_v0  ;;  %s543_s26 = sshll.u32 %s746_s22, 3  ;;  %s295_s29 = scalar_lea.vmem %s737_s2, %s746_s22 }
  0x14   : > { %s287_s7 = scalar_lea.vmem %s736_s1, %s543_s26  ;;  %s300_s10 = scalar_lea.vmem %s738_s3, %s543_s26 }
  0x15   : > { %s304_s13 = scalar_lea.vmem %s739_s4, %s543_s26  ;;  %s310_s16 = scalar_lea.vmem %s740_s5, %s746_s22 }
  0x16   : > { %323 = sbr.rel (%p547_p5) target bundleno = 356 (0x164), region = 44 }
  0x1b   : > { %v326_v1 = vld [vmem:[%s300_s10] sm:$0x1f]  ;;  %v632_v2 = vmov 0   ;;  %vm328_vm1 = vcmask 1044480   ;;  %v377_v34 = vlaneseq  ;;  %v633_v45 = vmov 0.0  }
  0x1c   : > { %582 = vset.pattern.permute.xlu0 %v632_v2  ;;  %v327_v3 = vld [vmem:[%s304_s13] sm:$0x1f]  ;;  %v404_v57 = vstv %s685_s25  ;;  %vm410_vm8 = vcmask 1040384  }
  0x1d   : > { %366 = vperm.xlu0 %582, %v326_v1   ;;  %v324_v4 = vld [vmem:[%s287_s7] sm:$0x1f]  ;;  %v378_v38 = vshrl.u32 %v377_v34, 7  ;;  %v401_v56 = vand.u32 127, %v377_v34 }
  0x1e   : > { %v329_v5 = vsel %vm328_vm1, %v324_v4, -inf  ;;  %v583_v39 = vld [vmem:[%s295_s29] ss:$0 sm:$0xff] }
  0x1f   : > { %v330_v6 = vrot.slane %v329_v5, 4  ;;  %vm380_vm6 = vcmp.eq.s32.totalorder %v378_v38, %v583_v39  ;;  %vm405_vm7 = vcmp.lt.s32.totalorder %v401_v56, %v404_v57 }
  0x20   : > { %v548_v46 = vsel %vm380_vm6, 1.0, %v633_v45  ;;  %v549_v63 = vsel %vm405_vm7, 1.0, %v633_v45 }
  0x21   : > { %v331_v7 = vmax.f32 %v329_v5, %v330_v6 }
  0x23   : > { %v332_v8 = vrot.slane %v331_v7, 2 }
  0x25   : > { %385 = vperm.xlu0 %582, %v327_v3   ;;  %v333_v9 = vmax.f32 %v331_v7, %v332_v8 }
  0x27   : > { %v334_v10 = vrot.slane %v333_v9, 1 }
  0x29   : > { %v335_v11 = vmax.f32 %v333_v9, %v334_v10  ;;  %v408_v10 = vld [vmem:[#allocation2] sm:$0x1] }
  0x2b   : > { %v336_v12 = vsub.f32 %v324_v4, %v335_v11 }
  0x2d   : > { %v337_v13 = vmul.f32 1.442695, %v336_v12 }
  0x2f   : > { %584 = vpow2.f32 %v337_v13 }
  0x35   : > { %v585_v14 = vpop.eup %584 }
  0x36   : > { %v339_v15 = vsel %vm328_vm1, %v585_v14, 0.0 }
  0x37   : > { %v340_v16 = vrot.slane %v339_v15, 4 }
  0x39   : > { %v341_v17 = vadd.f32 %v340_v16, %v339_v15 }
  0x3b   : > { %v342_v18 = vrot.slane %v341_v17, 2 }
  0x3d   : > { %v343_v19 = vadd.f32 %v342_v18, %v341_v17 }
  0x3f   : > { %v344_v20 = vrot.slane %v343_v19, 1 }
  0x41   : > { %v345_v21 = vadd.f32 %v344_v20, %v343_v19 }
  0x43   : > { %586 = vrcp.f32 %v345_v21  ;;  %vm351_vm2 = vweird.f32 %v345_v21  ;;  %v357_v26 = vand.u32 2147483648, %v345_v21  ;;  %v355_v28 = vand.u32 2147483647, %v345_v21 }
  0x45   : > { %v358_v29 = vor.u32 1.1754944e-38, %v357_v26  ;;  %vm356_vm5 = vcmp.eq.f32.partialorder %v355_v28, 8.507059e+37 }
  0x49   : > { %v587_v22 = vpop.eup %586 }
  0x4a   : > { %v347_v23 = vmul.f32 %v587_v22, %v345_v21  ;;  %vm352_vm3 = vweird.f32 %v587_v22 }
  0x4b   : > { %vm353_vm4 = vmor %vm351_vm2, %vm352_vm3 }
  0x4c   : > { %v348_v24 = vsub.f32 1.0, %v347_v23 }
  0x4e   : > { %v349_v25 = vmul.f32 %v587_v22, %v348_v24 }
  0x50   : > { %v350_v27 = vadd.f32 %v587_v22, %v349_v25 }
  0x52   : > { %v354_v30 = vsel %vm353_vm4, %v587_v22, %v350_v27 }
  0x53   : > { %v359_v31 = vsel %vm356_vm5, %v358_v29, %v354_v30 }
  0x54   : > { %v361_v32 = vmul.f32 %v585_v14, %v359_v31 }
  0x56   : > { %v362_v33 = vmul.f32 1.442695, %v361_v32 }
  0x58   : > { %588 = vpow2.f32 %v362_v33 }
  0x5e   : > { %v589_v35 = vpop.eup %588 }
  0x8f   : > { %v367_v36 = vpop.permute.xlu0 %366 }
  0x90   : > { %v369_v37 = vmul.f32 %v589_v35, %v367_v36 }
  0x92   : > { %v370_v40 = vsel %vm328_vm1, %v369_v37, 0.0 }
  0x93   : > { %v371_v41 = vrot.slane %v370_v40, 4 }
  0x95   : > { %v372_v42 = vadd.f32 %v371_v41, %v370_v40 }
  0x97   : > { %v373_v43 = vrot.slane %v372_v42, 2  ;;  %v386_v44 = vpop.permute.xlu0 %385 }
  0x98   : > { %v388_v47 = vadd.f32 %v386_v44, %v361_v32 }
  0x99   : > { %v374_v48 = vadd.f32 %v373_v43, %v372_v42 }
  0x9a   : > { %v389_v49 = vmul.f32 %v548_v46, %v388_v47 }
  0x9b   : > { %v375_v50 = vrot.slane %v374_v48, 1 }
  0x9c   : > { %v390_v51 = vsel %vm328_vm1, %v389_v49, 0.0 }
  0x9d   : > { %v376_v52 = vadd.f32 %v375_v50, %v374_v48  ;;  %v391_v53 = vrot.slane %v390_v51, 4 }
  0x9f   : > { %v392_v54 = vadd.f32 %v391_v53, %v390_v51  ;;  %590 = vlog2.f32 %v376_v52 }
  0xa1   : > { %v393_v55 = vrot.slane %v392_v54, 2 }
  0xa3   : > { %v394_v58 = vadd.f32 %v393_v55, %v392_v54 }
  0xa5   : > { %v591_v59 = vpop.eup %590  ;;  %v395_v60 = vrot.slane %v394_v58, 1 }
  0xa6   : > { %v398_v61 = vmul.f32 0.6931472, %v591_v59 }
  0xa7   : > { %v396_v62 = vadd.f32 %v395_v60, %v394_v58 }
  0xa9   : > { %v399_v0 = vsub.f32 %v398_v61, %v396_v62 }
  0xab   : > { %v409_v1 = vmul.f32 %v549_v63, %v399_v0 }
  0xad   : > { %v411_v2 = vsel %vm410_vm8, %v409_v1, 0.0 }
  0xae   : > { %412 = vadd.xlane.f32.xlu1 %v411_v2 }
 0x121   : > { %v413_v3 = vpop.xlane.xlu1 %412 }
 0x122   : > { %v414_v4 = vrot.slane %v413_v3, 4 }
 0x124   : > { %v415_v5 = vadd.f32 %v414_v4, %v413_v3 }
 0x126   : > { %v416_v6 = vrot.slane %v415_v5, 2 }
 0x128   : > { %v417_v7 = vadd.f32 %v416_v6, %v415_v5 }
 0x12a   : > { %v418_v8 = vrot.slane %v417_v7, 1 }
 0x12c   : > { %v419_v9 = vadd.f32 %v418_v8, %v417_v7 }
 0x12e   : > { %552 = vpush %v419_v9 }
 0x15f   : > { %s553_s19 = spop %552 }
 0x160   : > { %v421_v11 = vstv %s553_s19 }
 0x161   : > { %v422_v12 = vadd.f32 %v421_v11, %v408_v10 }
 0x163   : > { %424 = vst.msk [vmem:[#allocation2] sm:$0x1] %vm315_vm0, %v422_v12 }
 0x164 PF:  {}
 0x16a   : > { %v428_v13 = vld [vmem:[#allocation2] sm:$0x1] }
 0x16b   : > { %430 = vst.msk [vmem:[%s310_s16] sm:$0x1] %vm315_vm0, %v428_v13 }
 0x16c PF: > { %s23_s24 = sadd.s32 1, %s628_s24   ;;  %s741_s22 = smov %s624_s23 }
 0x16d   : > { %p20_p6 = scmp.ge.s32.totalorder %s23_s24, 4   ;;  %s742_s23 = smov %s744_s0 }
 0x16f   :  { %22 = sbr.rel (!%p20_p6) target bundleno = 8 (0x8), region = 87 }

</bundles_post_ra>
